<compile_context>
chip_gen: v5e
topology: v5e:2x2
jax: 0.10.0
libtpu: 0.0.40
codegen_flags: <defaults>
</compile_context>

<pallas_src>
import jax
import jax.numpy as jnp
from jax import lax
from jax.experimental import pallas as pl
from jax.experimental.pallas import tpu as pltpu

LN_EPS = 1e-5  # PyTorch nn.LayerNorm default


def addnorm_kernel(x_ref, y_ref, gamma_ref, beta_ref, o_ref):
    # dropout(Y) == Y in eval mode.
    # Upcast before the residual add (v5e has no bf16 VPU; free elsewhere).
    x_f32 = x_ref[...].astype(jnp.float32)
    y_f32 = y_ref[...].astype(jnp.float32)
    s = x_f32 + y_f32                                   # (row_tile, hidden)
    mean = jnp.mean(s, axis=-1, keepdims=True)
    centered = s - mean
    var = jnp.mean(centered * centered, axis=-1, keepdims=True)
    inv_std = lax.rsqrt(var + LN_EPS)
    out = centered * inv_std
    out = out * gamma_ref[...].astype(jnp.float32) + beta_ref[...].astype(jnp.float32)
    o_ref[...] = out.astype(o_ref.dtype)


# Roofline-saturating per-stream block size; bigger tiles add VMEM pressure
# without bandwidth benefit for a pure-streaming kernel.
_TARGET_BLOCK_BYTES = 2 * 1024 * 1024
# Keep >= 8 grid steps so v7x's two TensorCores each get >= 4 steps of
# pipelined work (neutral on single-TC v5e/v6e).
_MIN_GRID_STEPS = 8


def _pick_row_tile(rows, hidden, dtype):
    bytes_el = jnp.dtype(dtype).itemsize
    # Sublane packing granule: 8 rows for f32, 16 for bf16, 32 for 8-bit.
    sublane = max(8, 32 // max(1, bytes_el))
    # Target ~2 MiB per streamed block, clamped to [sublane, 2048] rows.
    row_tile = _TARGET_BLOCK_BYTES // max(1, hidden * bytes_el)
    row_tile = max(sublane, min(2048, row_tile))
    # Prefer >= _MIN_GRID_STEPS grid steps when the problem is big enough.
    per_step = (rows + _MIN_GRID_STEPS - 1) // _MIN_GRID_STEPS
    if row_tile > per_step:
        row_tile = max(sublane, per_step)
    # Align down to the sublane packing granule.
    row_tile = max(sublane, (row_tile // sublane) * sublane)
    return row_tile


def add_norm(x, y, gamma, beta, *, row_tile=None):
    """x, y: (batch, seq, hidden); gamma, beta: (hidden,)."""
    batch, seq, hidden = x.shape
    rows = batch * seq

    x2 = x.reshape(rows, hidden)
    y2 = y.reshape(rows, hidden)
    g2 = gamma.reshape(1, hidden)
    b2 = beta.reshape(1, hidden)

    if row_tile is None:
        row_tile = _pick_row_tile(rows, hidden, x.dtype)

    # Ragged tail handled by Pallas partial blocks: OOB reads only feed rows
    # whose (row-independent) outputs are masked on the final partial store.
    num_tiles = pl.cdiv(rows, row_tile)

    # True VMEM footprint: 3 streams x 2 double-buffers x tile (native dtype)
    # + in-kernel f32 temporaries (~4 live tiles) + resident gamma/beta.
    bytes_el = jnp.dtype(x.dtype).itemsize
    streamed = 3 * 2 * row_tile * hidden * bytes_el
    f32_temps = 4 * row_tile * hidden * 4
    params = 4 * hidden * 4
    needed = streamed + f32_temps + params
    vmem_limit = int(max(needed + (2 << 20), 16 * 1024 * 1024))

    out = pl.pallas_call(
        addnorm_kernel,
        out_shape=jax.ShapeDtypeStruct((rows, hidden), x.dtype),
        grid_spec=pltpu.PrefetchScalarGridSpec(
            num_scalar_prefetch=0,
            grid=(num_tiles,),
            in_specs=[
                pl.BlockSpec((row_tile, hidden), lambda i: (i, 0)),
                pl.BlockSpec((row_tile, hidden), lambda i: (i, 0)),
                # gamma/beta: constant index_map -> resident in VMEM across
                # grid steps, broadcast lane-wise against (row_tile, hidden).
                pl.BlockSpec((1, hidden), lambda i: (0, 0)),
                pl.BlockSpec((1, hidden), lambda i: (0, 0)),
            ],
            out_specs=pl.BlockSpec((row_tile, hidden), lambda i: (i, 0)),
        ),
        compiler_params=pltpu.CompilerParams(
            dimension_semantics=("parallel",),
            vmem_limit_bytes=vmem_limit,
        ),
    )(x2, y2, g2, b2)

    return out.reshape(batch, seq, hidden)


if __name__ == "__main__":
    batch, seq, hidden = 2, 8, 32

    key = jax.random.PRNGKey(0)
    kx, ky = jax.random.split(key)
    x = jax.random.normal(kx, (batch, seq, hidden), dtype=jnp.float32)
    y = jax.random.normal(ky, (batch, seq, hidden), dtype=jnp.float32)

    # LayerNorm parameters, deterministic init (same as PyTorch defaults).
    gamma = jnp.ones((hidden,), dtype=jnp.float32)
    beta = jnp.zeros((hidden,), dtype=jnp.float32)

    out = add_norm(x, y, gamma, beta)
    out = jax.block_until_ready(out)

    # Pure-JAX reference check.
    s = x + y
    mean = jnp.mean(s, axis=-1, keepdims=True)
    var = jnp.mean((s - mean) ** 2, axis=-1, keepdims=True)
    ref = (s - mean) / jnp.sqrt(var + LN_EPS) * gamma + beta

    assert out.shape == (batch, seq, hidden)
    assert jnp.allclose(out, ref, atol=1e-5, rtol=1e-5), "mismatch vs reference"
    print("KERNEL_OK")
</pallas_src>

<mosaic_0001>
module attributes {stable_mosaic.version = 11 : i64} {
  func.func @addnorm_kernel(%arg0: i32, %arg1: memref<8x32xf32, #tpu.memory_space<vmem>>, %arg2: memref<8x32xf32, #tpu.memory_space<vmem>>, %arg3: memref<1x32xf32, #tpu.memory_space<vmem>>, %arg4: memref<1x32xf32, #tpu.memory_space<vmem>>, %arg5: memref<8x32xf32, #tpu.memory_space<vmem>>) attributes {dimension_semantics = [#tpu.dimension_semantics<parallel>], iteration_bounds = array<i64: 2>, scalar_prefetch = 0 : i64, scratch_operands = 0 : i64, tpu.core_type = #tpu.core_type<tc>, window_params = [{transform_indices = @transform_0, window_bounds = array<i64: 8, 32>}, {transform_indices = @transform_1, window_bounds = array<i64: 8, 32>}, {pipeline_mode = #tpu.pipeline_mode<synchronous>, transform_indices = @transform_2, window_bounds = array<i64: 1, 32>}, {pipeline_mode = #tpu.pipeline_mode<synchronous>, transform_indices = @transform_3, window_bounds = array<i64: 1, 32>}, {transform_indices = @transform_4, window_bounds = array<i64: 8, 32>}]} {
    %c0 = arith.constant 0 : index
    %c0_0 = arith.constant 0 : index
    %0 = vector.load %arg1[%c0, %c0_0] : memref<8x32xf32, #tpu.memory_space<vmem>>, vector<8x32xf32>
    %c0_1 = arith.constant 0 : index
    %c0_2 = arith.constant 0 : index
    %1 = vector.load %arg2[%c0_1, %c0_2] : memref<8x32xf32, #tpu.memory_space<vmem>>, vector<8x32xf32>
    %2 = arith.addf %0, %1 : vector<8x32xf32>
    %cst = arith.constant dense<0.000000e+00> : vector<8xf32>
    %3 = vector.multi_reduction <add>, %2, %cst [1] : vector<8x32xf32> to vector<8xf32>
    %4 = vector.shape_cast %3 : vector<8xf32> to vector<8x1xf32>
    %cst_3 = arith.constant 3.200000e+01 : f32
    %5 = vector.broadcast %cst_3 : f32 to vector<8x1xf32>
    %6 = arith.divf %4, %5 : vector<8x1xf32>
    %7 = vector.broadcast %6 : vector<8x1xf32> to vector<8x32xf32>
    %8 = arith.subf %2, %7 : vector<8x32xf32>
    %9 = arith.mulf %8, %8 : vector<8x32xf32>
    %cst_4 = arith.constant dense<0.000000e+00> : vector<8xf32>
    %10 = vector.multi_reduction <add>, %9, %cst_4 [1] : vector<8x32xf32> to vector<8xf32>
    %11 = vector.shape_cast %10 : vector<8xf32> to vector<8x1xf32>
    %cst_5 = arith.constant 3.200000e+01 : f32
    %12 = vector.broadcast %cst_5 : f32 to vector<8x1xf32>
    %13 = arith.divf %11, %12 : vector<8x1xf32>
    %cst_6 = arith.constant 9.99999974E-6 : f32
    %14 = vector.broadcast %cst_6 : f32 to vector<8x1xf32>
    %15 = arith.addf %13, %14 : vector<8x1xf32>
    %16 = math.rsqrt %15 : vector<8x1xf32>
    %17 = vector.broadcast %16 : vector<8x1xf32> to vector<8x32xf32>
    %18 = arith.mulf %8, %17 : vector<8x32xf32>
    %c0_7 = arith.constant 0 : index
    %c0_8 = arith.constant 0 : index
    %19 = vector.load %arg3[%c0_7, %c0_8] : memref<1x32xf32, #tpu.memory_space<vmem>>, vector<1x32xf32>
    %20 = vector.broadcast %19 : vector<1x32xf32> to vector<8x32xf32>
    %21 = arith.mulf %18, %20 : vector<8x32xf32>
    %c0_9 = arith.constant 0 : index
    %c0_10 = arith.constant 0 : index
    %22 = vector.load %arg4[%c0_9, %c0_10] : memref<1x32xf32, #tpu.memory_space<vmem>>, vector<1x32xf32>
    %23 = vector.broadcast %22 : vector<1x32xf32> to vector<8x32xf32>
    %24 = arith.addf %21, %23 : vector<8x32xf32>
    %c0_11 = arith.constant 0 : index
    %c0_12 = arith.constant 0 : index
    %25 = vector.load %arg5[%c0_11, %c0_12] : memref<8x32xf32, #tpu.memory_space<vmem>>, vector<8x32xf32>
    tpu.vector_store %arg5[%c0_11, %c0_12], %24 {strides = array<i32>} : memref<8x32xf32, #tpu.memory_space<vmem>>, vector<8x32xf32>,
    return
  }
  func.func @transform_0(%arg0: i32) -> (i32, i32) {
    %c0_i32 = arith.constant 0 : i32
    %c0_i32_0 = arith.constant 0 : i32
    return %arg0, %c0_i32 : i32, i32
  }
  func.func @transform_1(%arg0: i32) -> (i32, i32) {
    %c0_i32 = arith.constant 0 : i32
    %c0_i32_0 = arith.constant 0 : i32
    return %arg0, %c0_i32 : i32, i32
  }
  func.func @transform_2(%arg0: i32) -> (i32, i32) {
    %c0_i32 = arith.constant 0 : i32
    %c0_i32_0 = arith.constant 0 : i32
    %c0_i32_1 = arith.constant 0 : i32
    return %c0_i32, %c0_i32_0 : i32, i32
  }
  func.func @transform_3(%arg0: i32) -> (i32, i32) {
    %c0_i32 = arith.constant 0 : i32
    %c0_i32_0 = arith.constant 0 : i32
    %c0_i32_1 = arith.constant 0 : i32
    return %c0_i32, %c0_i32_0 : i32, i32
  }
  func.func @transform_4(%arg0: i32) -> (i32, i32) {
    %c0_i32 = arith.constant 0 : i32
    %c0_i32_0 = arith.constant 0 : i32
    return %arg0, %c0_i32 : i32, i32
  }
}

</mosaic_0001>

<bundles_post_ra>
// kernel: tpu_custom_call.1
= control target key start
LH: loop header
LB: loop body
LE: loop exit
PB: predicated region body
PF: predicated region fallthrough
CT: control target
= control target key end

     0   :  { %s812_s0 = inlined_call_operand.hbm [shape: f32[16,32], index: 0, kind: input, shape index: {}]   ;;  %s813_s1 = inlined_call_operand.hbm [shape: f32[16,32], index: 1, kind: input, shape index: {}]   ;;  %s814_s2 = inlined_call_operand.vmem [shape: f32[1,32], index: 2, kind: input, shape index: {}]   ;;  %s815_s3 = inlined_call_operand.vmem [shape: f32[1,32], index: 3, kind: input, shape index: {}]   ;;  %s816_s4 = inlined_call_operand.hbm [shape: f32[16,32], index: 4, kind: output, shape index: {}]  }
   0x1   :  { %817 = sst [smem:[#allocation11_spill]] %s812_s0 }
   0x2   :  { %9 = vsyncpa [#allocation3], 0 }
   0x3   :  { %11 = vsyncpa [#allocation3 + $0x1], 0 }
   0x4   :  { %12 = vsyncpa [#allocation6], 0 }
   0x5   :  { %14 = vsyncpa [#allocation6 + $0x1], 0 }
   0x6   :  { %15 = vsyncpa [#allocation4], 0 }
   0x7   :  { %17 = vsyncpa [#allocation4 + $0x1], 0  ;;  %s638_s15 = smov 0   ;;  %s640_s16 = smov 0  }
   0x8   :  { %s642_s17 = smov 0   ;;  %s644_s18 = smov 0  }
   0x9 LB: > { %s659_s19 = sadd.s32 4294967295, %s610_s18   ;;  %s407_s20 = sadd.s32 4294967294, %s610_s18   ;;  %s610_s18 = sphi %s644_s18, %s829_s18   ;;  %s606_s17 = sphi %s642_s17, %s828_s17   ;;  %s602_s16 = sphi %s640_s16, %s827_s16   ;;  %s598_s15 = sphi %s638_s15, %s826_s15  }
   0xa   : > { %s663_s21 = sadd.s32 1, %s610_s18   ;;  %s30_s22 = sadd.s32 1, %s606_s17 }
   0xb   : > { %s27_s23 = ssub.s32 %s610_s18, %s663_s21  ;;  %p37_p0 = scmp.ne.s32.totalorder %s606_s17, %s602_s16 }
   0xc   : > { %p28_p1 = scmp.eq.s32.totalorder %s27_s23, 0  ;;  %p38_p2 = scmp.eq.s32.totalorder %s610_s18, 0 }
   0xd   : > { %p43_p3 = scmp.ne.s32.totalorder %s602_s16, %s598_s15  ;;  %p44_p4 = scmp.eq.s32.totalorder %s659_s19, 0 }
   0xe   : > { %s675_s24 = scalar_select %p28_p1, %s606_s17, %s30_s22  }
   0xf   : > { %p677_p5 = por %p38_p2, %p37_p0  ;;  %p681_p6 = por %p44_p4, %p43_p3 }
  0x10   : > { %p135_p7 = scmp.eq.s32.totalorder %s659_s19, 1  ;;  %p141_p8 = scmp.eq.s32.totalorder %s407_s20, 1 }
  0x11   : > { %p439_p10 = scmp.lt.s32.totalorder %s610_s18, 2  ;;  %s697_s29 = sand.u32 1, %s606_s17  }
  0x12   : > { %p688_p11 = por %p135_p7, %p37_p0  ;;  %p692_p12 = por %p141_p8, %p43_p3 }
  0x13   : > { %s411_s30 = sshll.u32 %s610_s18, 3  ;;  %s410_s5 = sshll.u32 %s697_s29, 3 }
  0x14   : > { %s822_s0 = sld [smem:[#allocation11_spill]]  ;;  %s171_s10 = scalar_lea.vmem [#allocation2], %s410_s5 }
  0x15   : > { %s179_s11 = sshll.u32 %s171_s10, 4  ;;  %p706_p13 = pnand %p439_p10, %p677_p5  ;;  %s180_s11 = int_to_ptr.vmem [resolvable:$true] %s179_s11 }
  0x16   : > { %p414_p0 = scmp.ge.s32.totalorder %s610_s18, 1  ;;  %p203_p1 = scmp.lt.s32.totalorder %s610_s18, 3 }
  0x17   : > { %s168_s13 = scalar_lea.sflag [#allocation3], %s697_s29  ;;  %p484_p3 = pneg %p706_p13 }
  0x1a   : > { %s175_s8 = scalar_lea.hbm %s822_s0, %s411_s30  ;;  %s487_s25 = scalar_lea.hbm %s822_s0, 16 }
  0x1b   : > { %s177_s9 = sshll.u32 %s175_s8, 4  ;;  %s178_s9 = int_to_ptr.hbm [resolvable:$true] %s177_s9 }
  0x1c   : > { %s480_s14 = sshra.s32 %s178_s9, 4  ;;  %s481_s14 = int_to_ptr.hbm [resolvable:$true] %s480_s14 }
  0x1d   : > { %s482_s20 = scalar_lea.hbm %s481_s14, 8  ;;  %p488_p5 = scmp.lt.s32.totalorder %s481_s14, %s822_s0 }
  0x1e   : > { %p483_p2 = scmp.ne.s32.totalorder %s481_s14, %s482_s20  ;;  %p489_p8 = scmp.lt.s32.totalorder %s487_s25, %s482_s20 }
  0x20   : > { %p485_p4 = pnand %p484_p3, %p483_p2  ;;  %p490_p10 = por %p489_p8, %p488_p5 }
  0x22   : > { %p486_p7 = pneg %p485_p4 }
  0x24   : > { %p491_p9 = pnand %p490_p10, %p486_p7 }
  0x26   : > { %494 = shalt.err (!%p491_p9)
}
  0x27   : > { %431 = dma.hbm_to_vmem [thread:$0]  (!%p706_p13), %s178_s9, 128, %s180_s11, %s168_s13  }
  0x28   : > { %p730_p2 = pnand %p414_p0, %p203_p1  ;;  %s194_s14 = scalar_lea.hbm %s813_s1, %s411_s30 }
  0x29   : > { %s196_s20 = sshll.u32 %s194_s14, 4  ;;  %s190_s23 = scalar_lea.vmem [#allocation5], %s410_s5  ;;  %s197_s20 = int_to_ptr.hbm [resolvable:$true] %s196_s20 }
  0x2a   : > { %s198_s25 = sshll.u32 %s190_s23, 4  ;;  %s187_s6 = scalar_lea.sflag [#allocation6], %s697_s29  ;;  %s199_s25 = int_to_ptr.vmem [resolvable:$true] %s198_s25 }
  0x2b   : > { %s510_s7 = sshra.s32 %s197_s20, 4  ;;  %s517_s13 = scalar_lea.hbm %s813_s1, 16  ;;  %s511_s7 = int_to_ptr.hbm [resolvable:$true] %s510_s7 }
  0x2c   : > { %s512_s0 = scalar_lea.hbm %s511_s7, 8  ;;  %p518_p4 = scmp.lt.s32.totalorder %s511_s7, %s813_s1 }
  0x2d   : > { %p513_p9 = scmp.ne.s32.totalorder %s511_s7, %s512_s0  ;;  %p519_p7 = scmp.lt.s32.totalorder %s517_s13, %s512_s0 }
  0x2f   : > { %p515_p0 = pnand %p513_p9, %p484_p3  ;;  %p520_p5 = por %p519_p7, %p518_p4 }
  0x31   : > { %p516_p1 = pneg %p515_p0 }
  0x33   : > { %p521_p8 = pnand %p520_p5, %p516_p1 }
  0x35   : > { %524 = shalt.err (!%p521_p8)
}
  0x36   : > { %434 = dma.hbm_to_vmem [thread:$0]  (!%p706_p13), %s197_s20, 128, %s199_s25, %s187_s6  }
  0x37   : > { %207 = sbr.rel (%p730_p2) target bundleno = 337 (0x151), region = 36  ;;  %s752_s29 = sand.u32 (!%p730_p2), 1, %s602_s16  }
  0x38   : > { %s755_s5 = sshll.u32 (!%p730_p2), %s752_s29, 3  ;;  %s210_s22 = scalar_lea.sflag (!%p730_p2), [#allocation3], %s752_s29 }
  0x39   : > { %s213_s0 = scalar_lea.vmem (!%p730_p2), [#allocation2], %s755_s5 }
  0x3c   : > { %585 = dma.done.wait (%p681_p6), %s210_s22, 128  }
  0x3d   : > { %587 = vsyncadd (%p681_p6), %s210_s22, 4294967168  ;;  %s220_s12 = scalar_lea.sflag [#allocation6], %s752_s29  ;;  %s223_s8 = scalar_lea.vmem [#allocation5], %s755_s5 }
  0x3e   : > { %589 = dma.done.wait (%p681_p6), %s220_s12, 128  }
  0x3f   : > { %591 = vsyncadd (%p681_p6), %s220_s12, 4294967168  ;;  %v254_v0 = vld [vmem:[%s213_s0] sm:$0xff]  ;;  %v255_v1 = vld [vmem:[%s223_s8] sm:$0xff]  ;;  %vm257_vm0 = vcmask 261120   ;;  %v612_v4 = vmov 32.0   ;;  %s419_s26 = sshll.u32 %s659_s19, 3 }
  0x40   : > { %v256_v2 = vadd.f32 %v255_v1, %v254_v0  ;;  %476 = vrcp.f32 %v612_v4  ;;  %v474_v25 = vld [vmem:[%s814_s2] ss:$0 sm:$0xff]  ;;  %s309_s6 = scalar_lea.hbm %s816_s4, %s419_s26  ;;  %s253_s19 = scalar_lea.vmem [#allocation7], %s755_s5 }
  0x41   : > { %v475_v28 = vld [vmem:[%s815_s3] ss:$0 sm:$0xff]  ;;  %s311_s11 = sshll.u32 %s253_s19, 4  ;;  %s313_s13 = sshll.u32 %s309_s6, 4  ;;  %s312_s11 = int_to_ptr.vmem [resolvable:$true] %s311_s11  ;;  %s314_s13 = int_to_ptr.hbm [resolvable:$true] %s313_s13 }
  0x42   : > { %v258_v3 = vsel %vm257_vm0, %v256_v2, 0.0  ;;  %s299_s10 = scalar_lea.sflag [#allocation4], %s752_s29  ;;  %s554_s30 = sshra.s32 %s314_s13, 4  ;;  %s555_s30 = int_to_ptr.hbm [resolvable:$true] %s554_s30 }
  0x43   : > { %259 = vadd.xlane.f32.xlu0 %v258_v3  ;;  %s556_s22 = scalar_lea.hbm %s555_s30, 8  ;;  %s560_s5 = scalar_lea.hbm %s816_s4, 16 }
  0x44   : > { %p557_p6 = scmp.ne.s32.totalorder %s555_s30, %s556_s22  ;;  %p561_p10 = scmp.lt.s32.totalorder %s555_s30, %s816_s4 }
  0x45   : > { %p562_p2 = scmp.lt.s32.totalorder %s560_s5, %s556_s22 }
  0x46   : > { %v477_v5 = vpop.eup %476  ;;  %p558_p13 = pnand %p557_p6, %p688_p11 }
  0x47   : > { %v262_v6 = vmul.f32 32.0, %v477_v5  ;;  %vm266_vm1 = vweird.f32 %v477_v5  ;;  %p563_p9 = por %p562_p2, %p561_p10 }
  0x48   : > { %p559_p3 = pneg %p558_p13 }
  0x49   : > { %v263_v7 = vsub.f32 1.0, %v262_v6 }
  0x4a   : > { %p564_p0 = pnand %p563_p9, %p559_p3 }
  0x4b   : > { %v264_v8 = vmul.f32 %v477_v5, %v263_v7 }
  0x4d   : > { %v265_v9 = vadd.f32 %v477_v5, %v264_v8 }
  0x4f   : > { %v267_v10 = vsel %vm266_vm1, %v477_v5, %v265_v9 }
  0xb6   : > { %v260_v11 = vpop.xlane.xlu0 %259 }
  0xb7   : > { %v268_v12 = vmul.f32 %v267_v10, %v260_v11 }
  0xb9   : > { %v269_v13 = vsub.f32 %v256_v2, %v268_v12 }
  0xbb   : > { %v270_v14 = vmul.f32 %v269_v13, %v269_v13 }
  0xbd   : > { %v271_v15 = vsel %vm257_vm0, %v270_v14, 0.0 }
  0xbe   : > { %272 = vadd.xlane.f32.xlu0 %v271_v15 }
 0x131   : > { %v273_v16 = vpop.xlane.xlu0 %272 }
 0x132   : > { %v274_v17 = vmul.f32 %v273_v16, %v267_v10 }
 0x134   : > { %v275_v18 = vadd.f32 1e-05, %v274_v17 }
 0x136   : > { %478 = vrsqrt.f32 %v275_v18  ;;  %vm282_vm3 = vweird.f32 %v275_v18 }
 0x13c   : > { %v479_v19 = vpop.eup %478 }
 0x13d   : > { %v277_v20 = vmul.f32 %v479_v19, %v275_v18  ;;  %vm283_vm2 = vweird.f32 %v479_v19 }
 0x13e   : > { %vm284_vm4 = vmor %vm282_vm3, %vm283_vm2 }
 0x13f   : > { %v278_v21 = vmul.f32 %v479_v19, %v277_v20 }
 0x141   : > { %v279_v22 = vmul.f32 0.5, %v278_v21 }
 0x143   : > { %v280_v23 = vsub.f32 1.5, %v279_v22 }
 0x145   : > { %v281_v24 = vmul.f32 %v479_v19, %v280_v23 }
 0x147   : > { %v285_v26 = vsel %vm284_vm4, %v479_v19, %v281_v24 }
 0x148   : > { %v286_v27 = vmul.f32 %v285_v26, %v269_v13 }
 0x14a   : > { %v291_v29 = vmul.f32 %v474_v25, %v286_v27 }
 0x14c   : > { %v296_v30 = vadd.f32 %v475_v28, %v291_v29 }
 0x14e   : > { %297 = vst.msk [vmem:[%s253_s19] sm:$0xff] %vm257_vm0, %v296_v30 }
 0x14f   : > { %567 = shalt.err (!%p564_p0)
}
 0x150   : > { %426 = dma.vmem_to_hbm [thread:$0]  (%p688_p11), %s312_s11, 128, %s314_s13, %s299_s10  }
 0x151 PF: > { %s325_s29 = sand.u32 1, %s598_s15   ;;  %p825_p1 = scmp.ge.s32.totalorder %s610_s18, 2 }
 0x152   : > { %s326_s14 = scalar_lea.sflag [#allocation4], %s325_s29 }
 0x153   : > { %p436_p4 = pnand %p825_p1, %p692_p12 }
 0x155   : > { %p437_p7 = pneg %p436_p4 }
 0x157   : > { %593 = dma.done.wait (%p437_p7), %s326_s14, 128  }
 0x158   : > { %595 = vsyncadd (%p437_p7), %s326_s14, 4294967168  ;;  %p20_p5 = scmp.ge.s32.totalorder %s663_s21, 4   ;;  %s826_s15 = smov %s602_s16 }
 0x159   : > { %s827_s16 = smov %s606_s17  ;;  %s828_s17 = smov %s675_s24 }
 0x15a   : > { %s829_s18 = smov %s663_s21  ;;  %22 = sbr.rel (!%p20_p5) target bundleno = 9 (0x9), region = 94 }
 0x15f   :  { %332 = vsyncpa [#allocation3], 1 }
 0x160   :  { %334 = vsyncpa [#allocation3 + $0x1], 1 }
 0x161   :  { %335 = vsyncpa [#allocation6], 1 }
 0x162   :  { %337 = vsyncpa [#allocation6 + $0x1], 1 }
 0x163   :  { %338 = vsyncpa [#allocation4], 1 }
 0x164   :  { %340 = vsyncpa [#allocation4 + $0x1], 1 }

</bundles_post_ra>
